<compile_context>
chip_gen: v7x
topology: tpu7x:2x2x1
jax: 0.10.0
libtpu: 0.0.40
codegen_flags: <defaults>
</compile_context>

<pallas_src>
import math

import jax
import jax.numpy as jnp
from jax.experimental import pallas as pl
from jax.experimental.pallas import tpu as pltpu


def _pad_up(v, m):
    return ((v + m - 1) // m) * m


def _vmem_limit(footprint_bytes):
    # v5e/v6e: 128 MiB physical VMEM (scoped default only 16-32 MiB), v7x: 64
    # MiB/TC.  Ask for what we need plus headroom, never more than ~60 MiB.
    want = int(footprint_bytes) + (8 << 20)
    return int(min(60 << 20, max(32 << 20, want)))


# ---------------------------------------------------------------------------
# Kernel 1 (prologue, Fout <= Fin): fused feature transform.
#   y   = x_tile @ [W | W_loop]          (single MXU matmul, K = Fin)
#   xw  = y[:, :Fp]   (neighbor-transform features, bf16)
#   xwl = y[:, Fp:]   (self-loop features,          bf16)
# ---------------------------------------------------------------------------
def _transform_kernel(x_ref, w_ref, xw_ref, xwl_ref):
    fp = xw_ref.shape[-1]
    y = jnp.dot(x_ref[0], w_ref[...], preferred_element_type=jnp.float32)
    xw_ref[0] = y[:, :fp].astype(xw_ref.dtype)
    xwl_ref[0] = y[:, fp:].astype(xwl_ref.dtype)


def _feature_transform(x, w_cat, *, tn):
    """x: (B, Npad, Fin) bf16, w_cat: (Fin, 2*Fp) bf16 -> (xw, xwl) bf16."""
    B, Npad, Fin = x.shape
    F2 = w_cat.shape[1]
    Fp = F2 // 2
    grid = (B, Npad // tn)

    flops = 2 * B * Npad * Fin * F2
    bytes_accessed = B * Npad * Fin * 2 + Fin * F2 * 2 + 2 * B * Npad * Fp * 2
    footprint = (2 * (tn * Fin * 2)          # x tiles (double-buffered)
                 + 2 * (Fin * F2 * 2)        # resident weight (budget 2 bufs)
                 + 2 * 2 * (tn * Fp * 2))    # two bf16 output tiles

    return pl.pallas_call(
        _transform_kernel,
        out_shape=(jax.ShapeDtypeStruct((B, Npad, Fp), jnp.bfloat16),
                   jax.ShapeDtypeStruct((B, Npad, Fp), jnp.bfloat16)),
        grid_spec=pltpu.PrefetchScalarGridSpec(
            num_scalar_prefetch=0,
            grid=grid,
            in_specs=[
                pl.BlockSpec((1, tn, Fin), lambda b, i: (b, i, 0)),   # x tile
                pl.BlockSpec((Fin, F2), lambda b, i: (0, 0)),         # [W|Wl] resident
            ],
            out_specs=(
                pl.BlockSpec((1, tn, Fp), lambda b, i: (b, i, 0)),
                pl.BlockSpec((1, tn, Fp), lambda b, i: (b, i, 0)),
            ),
        ),
        compiler_params=pltpu.CompilerParams(
            dimension_semantics=("parallel", "parallel"),
            vmem_limit_bytes=_vmem_limit(footprint),
        ),
        cost_estimate=pl.CostEstimate(flops=flops, transcendentals=0,
                                      bytes_accessed=bytes_accessed),
    )(x, w_cat)


# ---------------------------------------------------------------------------
# Kernel 2 (main, Fout <= Fin): neighbor aggregation + self-loop + bias.
#   out[b, rows] = adj[rows] @ xw[b] + xwl[b, rows] + bias
# The adj row tile is loaded once per grid step and reused for every batch
# element (batch loop inside the kernel -> adj is never re-read per batch).
# ---------------------------------------------------------------------------
def _aggregate_kernel(adj_ref, xw_ref, xwl_ref, b_ref, o_ref):
    adj = adj_ref[...]                        # (tm, Npad) bf16, reused for all b
    bias = b_ref[...]                         # (1, Fp) f32
    for b in range(xw_ref.shape[0]):          # static unrolled batch loop
        agg = jnp.dot(adj, xw_ref[b], preferred_element_type=jnp.float32)
        o_ref[b] = (agg + xwl_ref[b].astype(jnp.float32) + bias).astype(o_ref.dtype)


def _aggregate(adj, xw, xwl, bias2d, *, tm, out_dtype):
    Npad = adj.shape[0]
    B, _, Fp = xw.shape
    grid = (Npad // tm,)
    osize = jnp.dtype(out_dtype).itemsize

    flops = 2 * B * Npad * Npad * Fp + 2 * B * Npad * Fp
    bytes_accessed = (Npad * Npad * 2          # adj read ONCE (not per batch)
                      + 2 * B * Npad * Fp * 2  # xw + xwl
                      + Fp * 4
                      + B * Npad * Fp * osize)
    footprint = (2 * (tm * Npad * 2)           # adj tiles (double-buffered)
                 + 2 * (B * Npad * Fp * 2)     # resident xw slab (budget 2 bufs)
                 + 2 * (B * tm * Fp * 2)       # self-loop tiles
                 + 2 * (B * tm * Fp * osize)   # output tiles
                 + 2 * (Fp * 4))

    return pl.pallas_call(
        _aggregate_kernel,
        out_shape=jax.ShapeDtypeStruct((B, Npad, Fp), out_dtype),
        grid_spec=pltpu.PrefetchScalarGridSpec(
            num_scalar_prefetch=0,
            grid=grid,
            in_specs=[
                pl.BlockSpec((tm, Npad), lambda i: (i, 0)),        # adj row tile
                pl.BlockSpec((B, Npad, Fp), lambda i: (0, 0, 0)),  # full xw (resident)
                pl.BlockSpec((B, tm, Fp), lambda i: (0, i, 0)),    # self-loop tile (pipelined)
                pl.BlockSpec((1, Fp), lambda i: (0, 0)),           # bias (resident)
            ],
            out_specs=pl.BlockSpec((B, tm, Fp), lambda i: (0, i, 0)),
        ),
        compiler_params=pltpu.CompilerParams(
            dimension_semantics=("parallel",),    # row tiles shard across TCs
            vmem_limit_bytes=_vmem_limit(footprint),
        ),
        cost_estimate=pl.CostEstimate(flops=flops, transcendentals=0,
                                      bytes_accessed=bytes_accessed),
    )(adj, xw, xwl, bias2d)


# ---------------------------------------------------------------------------
# Fused kernel (Fout > Fin):
#   out[b, rows] = (adj[rows] @ x[b]) @ W + x[b, rows] @ W_loop + bias
# Both feature transforms are fused into ONE MXU matmul:
#   concat([adj@x, x_rows], -1) @ vstack(W, W_loop)
# ---------------------------------------------------------------------------
def _fused_kernel(adj_ref, x_ref, xt_ref, w_ref, b_ref, o_ref):
    adj = adj_ref[...]
    bias = b_ref[...]
    for b in range(x_ref.shape[0]):           # static unrolled batch loop
        ax = jnp.dot(adj, x_ref[b], preferred_element_type=jnp.float32)
        stacked = jnp.concatenate([ax.astype(x_ref.dtype), xt_ref[b]], axis=-1)
        out = jnp.dot(stacked, w_ref[...], preferred_element_type=jnp.float32)
        o_ref[b] = (out + bias).astype(o_ref.dtype)


def _fused_gcn(adj, x, w_cat_k, bias2d, *, tm, out_dtype):
    Npad = adj.shape[0]
    B, _, Finp = x.shape
    Fp = w_cat_k.shape[1]
    grid = (Npad // tm,)
    osize = jnp.dtype(out_dtype).itemsize

    flops = 2 * B * Npad * (Npad * Finp + 2 * Finp * Fp) + 2 * B * Npad * Fp
    bytes_accessed = (Npad * Npad * 2 + 2 * B * Npad * Finp * 2
                      + 2 * Finp * Fp * 2 + Fp * 4 + B * Npad * Fp * osize)
    footprint = (2 * (tm * Npad * 2)
                 + 2 * (B * Npad * Finp * 2)   # resident x slab
                 + 2 * (B * tm * Finp * 2)
                 + 2 * (2 * Finp * Fp * 2)
                 + 2 * (B * tm * Fp * osize)
                 + 2 * (Fp * 4))

    return pl.pallas_call(
        _fused_kernel,
        out_shape=jax.ShapeDtypeStruct((B, Npad, Fp), out_dtype),
        grid_spec=pltpu.PrefetchScalarGridSpec(
            num_scalar_prefetch=0,
            grid=grid,
            in_specs=[
                pl.BlockSpec((tm, Npad), lambda i: (i, 0)),          # adj row tile
                pl.BlockSpec((B, Npad, Finp), lambda i: (0, 0, 0)),  # full x (resident)
                pl.BlockSpec((B, tm, Finp), lambda i: (0, i, 0)),    # self-loop rows (pipelined)
                pl.BlockSpec((2 * Finp, Fp), lambda i: (0, 0)),      # [W; W_loop] resident
                pl.BlockSpec((1, Fp), lambda i: (0, 0)),             # bias (resident)
            ],
            out_specs=pl.BlockSpec((B, tm, Fp), lambda i: (0, i, 0)),
        ),
        compiler_params=pltpu.CompilerParams(
            dimension_semantics=("parallel",),
            vmem_limit_bytes=_vmem_limit(footprint),
        ),
        cost_estimate=pl.CostEstimate(flops=flops, transcendentals=0,
                                      bytes_accessed=bytes_accessed),
    )(adj, x, x, w_cat_k, bias2d)


# ---------------------------------------------------------------------------
# Module mirror
# ---------------------------------------------------------------------------
class GraphConvolutionLayerPallas:
    """JAX/Pallas mirror of pixel2mesh.GraphConvolutionLayer.

    forward(x) == adj @ (x @ W) + x @ W_loop + bias  (dense adj shared across
    the batch; identical to the module's dot(adj, x@W, is_sparse=True) path).
    """

    def __init__(self, in_feats, out_feats, adj_mat, key=None,
                 out_dtype=jnp.float32):
        self.in_feats = int(in_feats)
        self.out_feats = int(out_feats)
        self.out_dtype = out_dtype            # bf16 here keeps activations bf16 between layers
        self.adj_mat = jnp.asarray(adj_mat, jnp.float32)
        self.n_nodes = self.adj_mat.shape[0]

        if key is None:
            key = jax.random.PRNGKey(0)
        kw, kl = jax.random.split(key)
        limit = math.sqrt(6.0 / (in_feats + out_feats))       # xavier_uniform_
        self.weight = jax.random.uniform(
            kw, (in_feats, out_feats), jnp.float32, -limit, limit)
        self.loop_weight = jax.random.uniform(
            kl, (in_feats, out_feats), jnp.float32, -limit, limit)
        self.bias = jnp.zeros((out_feats,), jnp.float32)

        self._build_cache()

    # -- one-time parameter prep (no per-call adj/weight casts or padding) ---
    def _build_cache(self):
        Fin, Fout, N = self.in_feats, self.out_feats, self.n_nodes
        self.f_pad = _pad_up(Fout, 128)        # lane-dense output stores
        self.n_pad = _pad_up(N, 128)
        # tm=256 keeps the (tm, Fp) f32 accumulator <= 32 vregs; 128 otherwise.
        self.tm = 256 if self.n_pad % 256 == 0 else 128
        self.tn = self.tm

        adj = self.adj_mat
        if self.n_pad != N:
            adj = jnp.pad(adj, ((0, self.n_pad - N), (0, self.n_pad - N)))
        self.adj_bf16 = adj.astype(jnp.bfloat16)        # cached bf16 adjacency

        self.bias_p = jnp.pad(self.bias, (0, self.f_pad - Fout)
                              ).reshape(1, self.f_pad).astype(jnp.float32)

        # Contract the N^2 aggregation matmul over the smaller feature dim.
        self.use_xw_first = Fout <= Fin
        if self.use_xw_first:
            wp = jnp.pad(self.weight, ((0, 0), (0, self.f_pad - Fout)))
            wlp = jnp.pad(self.loop_weight, ((0, 0), (0, self.f_pad - Fout)))
            self.w_cat = jnp.concatenate([wp, wlp], axis=1).astype(jnp.bfloat16)
            self.fin_pad = Fin
        else:
            # Pad Fin so the in-kernel concat([adj@x, x], -1) stays lane-aligned.
            self.fin_pad = _pad_up(Fin, 128)
            wp = jnp.pad(self.weight,
                         ((0, self.fin_pad - Fin), (0, self.f_pad - Fout)))
            wlp = jnp.pad(self.loop_weight,
                          ((0, self.fin_pad - Fin), (0, self.f_pad - Fout)))
            self.w_cat = jnp.concatenate([wp, wlp], axis=0).astype(jnp.bfloat16)

    def set_params(self, weight=None, loop_weight=None, bias=None):
        if weight is not None:
            self.weight = jnp.asarray(weight, jnp.float32)
        if loop_weight is not None:
            self.loop_weight = jnp.asarray(loop_weight, jnp.float32)
        if bias is not None:
            self.bias = jnp.asarray(bias, jnp.float32)
        self._build_cache()

    def forward(self, x):
        x = jnp.asarray(x)
        squeeze = x.ndim == 2                  # allow unbatched (N, Fin) input
        if squeeze:
            x = x[None]
        B, N, Fin = x.shape
        assert N == self.n_nodes and Fin == self.in_feats

        # bf16 for the MXU; a no-op if the previous layer already emitted bf16.
        xb = x.astype(jnp.bfloat16)
        if self.n_pad != N:
            xb = jnp.pad(xb, ((0, 0), (0, self.n_pad - N), (0, 0)))

        if self.use_xw_first:
            xw, xwl = _feature_transform(xb, self.w_cat, tn=self.tn)
            out = _aggregate(self.adj_bf16, xw, xwl, self.bias_p,
                             tm=self.tm, out_dtype=self.out_dtype)
        else:
            if self.fin_pad != Fin:
                xb = jnp.pad(xb, ((0, 0), (0, 0), (0, self.fin_pad - Fin)))
            out = _fused_gcn(self.adj_bf16, xb, self.w_cat, self.bias_p,
                             tm=self.tm, out_dtype=self.out_dtype)

        if self.n_pad != N or self.f_pad != self.out_feats:
            out = out[:, :N, :self.out_feats]
        return out[0] if squeeze else out

    __call__ = forward

    def __repr__(self):
        return '{} ({} -> {})'.format(
            self.__class__.__name__, self.in_feats, self.out_feats)


# --------------------------------------------- plain-JAX reference (checks)
def reference_forward(layer, x):
    out = jnp.matmul(x, layer.weight)
    out_loop = jnp.matmul(x, layer.loop_weight)
    out = jnp.einsum('ij,bjk->bik', layer.adj_mat, out) + out_loop
    return out + layer.bias


# -------------------------------------------------------------------- demo
if __name__ == "__main__":
    key = jax.random.PRNGKey(0)
    k_adj, k_a, k_b, k_xa, k_xb, k_ba, k_bb = jax.random.split(key, 7)

    B, N = 2, 256

    # Deterministic row-normalized adjacency (no self loops; the loop_weight
    # branch supplies the self contribution, as in pixel2mesh).
    mask = (jax.random.uniform(k_adj, (N, N)) < 0.05).astype(jnp.float32)
    adj = jnp.maximum(mask, mask.T) * (1.0 - jnp.eye(N, dtype=jnp.float32))
    deg = jnp.maximum(adj.sum(axis=1, keepdims=True), 1.0)
    adj = adj / deg

    def check(layer, x):
        out = jax.block_until_ready(layer(x))
        ref = jax.block_until_ready(reference_forward(layer, x))
        assert out.shape == ref.shape, (out.shape, ref.shape)
        rel = float(jnp.max(jnp.abs(out - ref)) / (jnp.max(jnp.abs(ref)) + 1e-6))
        assert rel < 2e-2, f"relative error too large: {rel}"

    # Case A: Fout < Fin (pixel2mesh layers) -> xw-first ordering + lane padding.
    FIN_A, FOUT_A = 96, 48
    layer_a = GraphConvolutionLayerPallas(FIN_A, FOUT_A, adj, key=k_a)
    layer_a.set_params(bias=0.1 * jax.random.normal(k_ba, (FOUT_A,), jnp.float32))
    x_a = jax.random.normal(k_xa, (B, N, FIN_A), jnp.float32)
    check(layer_a, x_a)

    # Case B: Fout > Fin -> fused (adj @ x) @ [W; W_loop] ordering.
    FIN_B, FOUT_B = 48, 96
    layer_b = GraphConvolutionLayerPallas(FIN_B, FOUT_B, adj, key=k_b)
    layer_b.set_params(bias=0.1 * jax.random.normal(k_bb, (FOUT_B,), jnp.float32))
    x_b = jax.random.normal(k_xb, (B, N, FIN_B), jnp.float32)
    check(layer_b, x_b)

    print("KERNEL_OK")
</pallas_src>

<mosaic_0001>
module attributes {stable_mosaic.version = 11 : i64} {
  func.func @_transform_kernel(%arg0: i32, %arg1: i32, %arg2: memref<1x256x96xbf16, #tpu.memory_space<vmem>>, %arg3: memref<96x256xbf16, #tpu.memory_space<vmem>>, %arg4: memref<1x256x128xbf16, #tpu.memory_space<vmem>>, %arg5: memref<1x256x128xbf16, #tpu.memory_space<vmem>>) attributes {dimension_semantics = [#tpu.dimension_semantics<parallel>, #tpu.dimension_semantics<parallel>], iteration_bounds = array<i64: 2, 1>, scalar_prefetch = 0 : i64, scratch_operands = 0 : i64, tpu.core_type = #tpu.core_type<tc>, window_params = [{transform_indices = @transform_0, window_bounds = array<i64: 1, 256, 96>}, {pipeline_mode = #tpu.pipeline_mode<synchronous>, transform_indices = @transform_1, window_bounds = array<i64: 96, 256>}, {transform_indices = @transform_2, window_bounds = array<i64: 1, 256, 128>}, {transform_indices = @transform_3, window_bounds = array<i64: 1, 256, 128>}]} {
    %c0 = arith.constant 0 : index
    %c0_0 = arith.constant 0 : index
    %c0_1 = arith.constant 0 : index
    %0 = vector.load %arg2[%c0, %c0_0, %c0_1] : memref<1x256x96xbf16, #tpu.memory_space<vmem>>, vector<1x256x96xbf16>
    %1 = vector.shape_cast %0 : vector<1x256x96xbf16> to vector<256x96xbf16>
    %c0_2 = arith.constant 0 : index
    %c0_3 = arith.constant 0 : index
    %2 = vector.load %arg3[%c0_2, %c0_3] : memref<96x256xbf16, #tpu.memory_space<vmem>>, vector<96x256xbf16>
    %cst = arith.constant dense<0.000000e+00> : vector<256x256xf32>
    %3 = tpu.matmul %1, %2, %cst {dimension_numbers = #tpu.dot_dimension_numbers<[1], [0], [0], [1], [0, 0, 1, 1], [], []>} : vector<256x96xbf16>, vector<96x256xbf16>, vector<256x256xf32> -> vector<256x256xf32>
    %4 = vector.extract_strided_slice %3 {offsets = [0, 0], sizes = [256, 128], strides = [1, 1]} : vector<256x256xf32> to vector<256x128xf32>
    %5 = arith.truncf %4 : vector<256x128xf32> to vector<256x128xbf16>
    %c0_4 = arith.constant 0 : index
    %c0_5 = arith.constant 0 : index
    %c0_6 = arith.constant 0 : index
    %6 = vector.load %arg4[%c0_4, %c0_5, %c0_6] : memref<1x256x128xbf16, #tpu.memory_space<vmem>>, vector<1x256x128xbf16>
    %7 = vector.shape_cast %6 : vector<1x256x128xbf16> to vector<256x128xbf16>
    %8 = vector.shape_cast %5 : vector<256x128xbf16> to vector<1x256x128xbf16>
    tpu.vector_store %arg4[%c0_4, %c0_5, %c0_6], %8 {strides = array<i32>} : memref<1x256x128xbf16, #tpu.memory_space<vmem>>, vector<1x256x128xbf16>,
    %9 = vector.extract_strided_slice %3 {offsets = [0, 128], sizes = [256, 128], strides = [1, 1]} : vector<256x256xf32> to vector<256x128xf32>
    %10 = arith.truncf %9 : vector<256x128xf32> to vector<256x128xbf16>
    %c0_7 = arith.constant 0 : index
    %c0_8 = arith.constant 0 : index
    %c0_9 = arith.constant 0 : index
    %11 = vector.load %arg5[%c0_7, %c0_8, %c0_9] : memref<1x256x128xbf16, #tpu.memory_space<vmem>>, vector<1x256x128xbf16>
    %12 = vector.shape_cast %11 : vector<1x256x128xbf16> to vector<256x128xbf16>
    %13 = vector.shape_cast %10 : vector<256x128xbf16> to vector<1x256x128xbf16>
    tpu.vector_store %arg5[%c0_7, %c0_8, %c0_9], %13 {strides = array<i32>} : memref<1x256x128xbf16, #tpu.memory_space<vmem>>, vector<1x256x128xbf16>,
    return
  }
  func.func @transform_0(%arg0: i32, %arg1: i32) -> (i32, i32, i32) {
    %c0_i32 = arith.constant 0 : i32
    %c0_i32_0 = arith.constant 0 : i32
    return %arg0, %arg1, %c0_i32 : i32, i32, i32
  }
  func.func @transform_1(%arg0: i32, %arg1: i32) -> (i32, i32) {
    %c0_i32 = arith.constant 0 : i32
    %c0_i32_0 = arith.constant 0 : i32
    %c0_i32_1 = arith.constant 0 : i32
    return %c0_i32, %c0_i32_0 : i32, i32
  }
  func.func @transform_2(%arg0: i32, %arg1: i32) -> (i32, i32, i32) {
    %c0_i32 = arith.constant 0 : i32
    %c0_i32_0 = arith.constant 0 : i32
    return %arg0, %arg1, %c0_i32 : i32, i32, i32
  }
  func.func @transform_3(%arg0: i32, %arg1: i32) -> (i32, i32, i32) {
    %c0_i32 = arith.constant 0 : i32
    %c0_i32_0 = arith.constant 0 : i32
    return %arg0, %arg1, %c0_i32 : i32, i32, i32
  }
}

</mosaic_0001>

<bundles_post_ra>
// kernel: tpu_custom_call.1
= control target key start
LH: loop header
LB: loop body
LE: loop exit
PB: predicated region body
PF: predicated region fallthrough
CT: control target
= control target key end

     0   :  { %9 = vsyncpa [#allocation3], 0  ;;  %s2021_s0 = inlined_call_operand.vmem [shape: bf16[2,256,96], index: 0, kind: input, shape index: {}]   ;;  %s2022_s1 = inlined_call_operand.vmem [shape: bf16[96,256], index: 1, kind: input, shape index: {}]   ;;  %s2023_s2 = inlined_call_operand.hbm [shape: bf16[2,256,128], index: 2, kind: output, shape index: {0}]   ;;  %s2024_s3 = inlined_call_operand.hbm [shape: bf16[2,256,128], index: 3, kind: output, shape index: {1}]  }
   0x1   :  { %11 = vsyncpa [#allocation3 + $0x1], 0 }
   0x2   :  { %12 = vsyncpa [#allocation5], 0 }
   0x3   :  { %14 = vsyncpa [#allocation5 + $0x1], 0  ;;  %s1742_s12 = smov 0   ;;  %s1744_s13 = smov 0  }
   0x4   :  { %s1746_s14 = smov 0   ;;  %s1748_s15 = smov 0  }
   0x5   :  { %s1750_s16 = smov 0   ;;  %s1752_s17 = smov 0  }
   0x6 LB: > { %s1114_s18 = sadd.s32 4294967295, %s1715_s17   ;;  %s1115_s19 = sadd.s32 4294967294, %s1715_s17   ;;  %s1715_s17 = sphi %s1752_s17, %s20_s17   ;;  %s1711_s16 = sphi %s1750_s16, %s2031_s16   ;;  %s1707_s15 = sphi %s1748_s15, %s2030_s15   ;;  %s1703_s14 = sphi %s1746_s14, %s2029_s14   ;;  %s1699_s13 = sphi %s1744_s13, %s2028_s13   ;;  %s1695_s12 = sphi %s1742_s12, %s2027_s12  }
   0x7   : > { %s32_s20 = sadd.s32 1, %s1711_s16  ;;  %s90_s21 = sadd.s32 1, %s1703_s14 }
   0x8   : > { %p34_p0 = scmp.ge.s32.totalorder %s32_s20, 2  ;;  %p100_p1 = scmp.ne.s32.totalorder %s1703_s14, %s1699_s13 }
   0x9   : > { %p101_p2 = scmp.eq.s32.totalorder %s1114_s18, 1  ;;  %p106_p3 = scmp.ne.s32.totalorder %s1699_s13, %s1695_s12 }
   0xa   : > { %s2033_s20 = smov (%p34_p0, %s32_s20), 0  ;;  %p107_p5 = scmp.eq.s32.totalorder %s1115_s19, 1 }
   0xb   : > { %p1782_p4 = por %p101_p2, %p100_p1  ;;  %s85_s23 = ssub.s32 %s1711_s16, %s2033_s20 }
   0xc   : > { %p1118_p6 = scmp.ge.s32.totalorder %s1715_s17, 1  ;;  %p88_p7 = scmp.eq.s32.totalorder %s85_s23, 0 }
   0xd   : > { %p1789_p8 = por %p107_p5, %p106_p3  ;;  %p169_p9 = scmp.lt.s32.totalorder %s1715_s17, 3 }
   0xe   : > { %s1795_s25 = scalar_select %p88_p7, %s1703_s14, %s90_s21  }
   0xf   : > { %p170_p10 = pnand %p1118_p6, %p169_p9 }
  0x10   : > { %v1571_v0 = vld [vmem:[%s2022_s1 + $0x4] ss:$8 sps:$4 sm:$0xff] (!%p170_p10)   ;;  %p203_p11 = scmp.lt.s32.totalorder (!%p170_p10), %s1707_s15, 1  ;;  %v1573_v1 = vld [vmem:[%s2022_s1] ss:$8 sps:$4 sm:$0xff] (!%p170_p10)   ;;  %v1717_v2 = vmov (!%p170_p10), 0  }
  0x11   : > { %173 = sbr.rel (%p170_p10) target bundleno = 353 (0x161), region = 28  ;;  %480 = vmatprep.mubr.bf16.mxu0 (!%p170_p10), %v1717_v2  ;;  %560 = vmatprep.mubr.bf16.mxu1 (!%p170_p10), %v1717_v2  ;;  %v1574_v3 = vld [vmem:[%s2022_s1 + $0x14] ss:$8 sps:$4 sm:$0xff] (!%p170_p10)   ;;  %v1576_v4 = vld [vmem:[%s2022_s1 + $0x10] ss:$8 sps:$4 sm:$0xff] (!%p170_p10)   ;;  %vm399_vm0 = vcmask (!%p170_p10), 785408  }
  0x12   : > { %448 = vmatprep.subr.bf16.mxu0 (!%p170_p10), %v1571_v0  ;;  %1496 = vmatprep.subr.bf16.mxu1 (!%p170_p10), %v1571_v0  ;;  %v1577_v5 = vld [vmem:[%s2022_s1 + $0x24] ss:$8 sps:$4 sm:$0xff] (!%p170_p10)   ;;  %v1579_v6 = vld [vmem:[%s2022_s1 + $0x20] ss:$8 sps:$4 sm:$0xff] (!%p170_p10)   ;;  %v1580_v7 = vld [vmem:[%s2022_s1 + $0x34] ss:$8 sps:$4 sm:$0xff] (!%p170_p10)  }
  0x13   : > { %449 = vmatpush1.bf16.msra.mxu0 (!%p170_p10), %v1573_v1  ;;  %1502 = vmatpush1.bf16.msra.mxu1 (!%p170_p10), %v1573_v1  ;;  %v1582_v8 = vld [vmem:[%s2022_s1 + $0x30] ss:$8 sps:$4 sm:$0xff] (!%p170_p10)   ;;  %v1583_v9 = vld [vmem:[%s2022_s1 + $0x44] ss:$8 sps:$4 sm:$0xff] (!%p170_p10)   ;;  %v1585_v10 = vld [vmem:[%s2022_s1 + $0x40] ss:$8 sps:$4 sm:$0xff] (!%p170_p10)  }
  0x14   : > { %450 = vmatprep.subr.bf16.mxu0 (!%p170_p10), %v1574_v3  ;;  %1497 = vmatprep.subr.bf16.mxu1 (!%p170_p10), %v1574_v3  ;;  %v1586_v11 = vld [vmem:[%s2022_s1 + $0x54] ss:$8 sps:$4 sm:$0xff] (!%p170_p10)   ;;  %v1588_v12 = vld [vmem:[%s2022_s1 + $0x50] ss:$8 sps:$4 sm:$0xff] (!%p170_p10)   ;;  %s1889_s11 = sand.u32 (!%p170_p10), 1, %s1699_s13   ;;  %s1718_s8 = smov (!%p170_p10), [#allocation2]  }
  0x15   : > { %s1119_s18 = sshll.u32 (!%p170_p10), %s1889_s11, 7  ;;  %s962_s6 = scalar_lea.sflag (!%p170_p10), [#allocation3], %s1889_s11 }
  0x16   : > { %s1892_s19 = scalar_lea.vmem (!%p170_p10), [#allocation2], %s1119_s18  ;;  %s1896_s21 = scalar_lea.vmem (!%p170_p10), [#allocation4], %s1119_s18 }
  0x17   : > { %451 = vmatpush1.bf16.msra.mxu0 (!%p170_p10), %v1576_v4  ;;  %1503 = vmatpush1.bf16.msra.mxu1 (!%p170_p10), %v1576_v4  ;;  %s982_s26 = sshll.u32 (!%p170_p10), %s1892_s19, 4  ;;  %s1000_s27 = sshll.u32 (!%p170_p10), %s1896_s21, 4  ;;  %s1932_s26 = int_to_ptr.vmem [resolvable:$true] %s982_s26  ;;  %s1939_s27 = int_to_ptr.vmem [resolvable:$true] %s1000_s27 }
  0x18   : > { %s204_s5 = scalar_select %p203_p11, %s1707_s15, 1  ;;  %452 = vmatprep.subr.bf16.mxu0 %v1577_v5  ;;  %1498 = vmatprep.subr.bf16.mxu1 %v1577_v5 }
  0x19   : > { %s1605_s7 = scalar_lea.vmem %s1932_s26, 2048  ;;  %s1609_s9 = sshll.u32 %s1718_s8, 4  ;;  %s1610_s9 = int_to_ptr.vmem [resolvable:$false] %s1609_s9 }
  0x1a   : > { %s1239_s10 = sshll.u32 %s204_s5, 7  ;;  %p1606_p12 = scmp.ne.s32.totalorder %s1932_s26, %s1605_s7 }
  0x1b   : > { %s1822_s23 = scalar_lea.vmem %s2021_s0, %s1239_s10  ;;  %453 = vmatpush1.bf16.msra.mxu0 %v1579_v6  ;;  %1504 = vmatpush1.bf16.msra.mxu1 %v1579_v6  ;;  %s1611_s10 = scalar_lea.vmem %s1610_s9, 4096 }
  0x1c   : > { %454 = vmatprep.subr.bf16.mxu0 %v1580_v7  ;;  %1499 = vmatprep.subr.bf16.mxu1 %v1580_v7  ;;  %v1589_v13 = vld [vmem:[%s1822_s23] sm:$0xff]   ;;  %v1591_v15 = vld [vmem:[%s1822_s23 + $0x8] sm:$0xff]   ;;  %v1593_v17 = vld [vmem:[%s1822_s23 + $0x10] sm:$0xff]   ;;  %p1607_p13 = pnand %p1606_p12, %p1782_p4  ;;  %p1612_p1 = scmp.lt.s32.totalorder %s1932_s26, %s1610_s9 }
  0x1d   : > { %v1590_v14 = vld [vmem:[%s1822_s23 + $0x40] sm:$0xff]   ;;  %v1592_v16 = vld [vmem:[%s1822_s23 + $0x48] sm:$0xff]   ;;  %v1594_v18 = vld [vmem:[%s1822_s23 + $0x50] sm:$0xff]   ;;  %p1613_p2 = scmp.lt.s32.totalorder %s1611_s10, %s1605_s7 }
  0x1e   : > { %v1595_v19 = vld [vmem:[%s1822_s23 + $0x18] sm:$0xff]   ;;  %v1597_v21 = vld [vmem:[%s1822_s23 + $0x20] sm:$0xff]   ;;  %v1599_v23 = vld [vmem:[%s1822_s23 + $0x28] sm:$0xff]   ;;  %p1608_p0 = pneg %p1607_p13 }
  0x1f   : > { %455 = vmatpush1.bf16.msra.mxu0 %v1582_v8  ;;  %1505 = vmatpush1.bf16.msra.mxu1 %v1582_v8  ;;  %v1596_v20 = vld [vmem:[%s1822_s23 + $0x58] sm:$0xff]   ;;  %v1598_v22 = vld [vmem:[%s1822_s23 + $0x60] sm:$0xff]   ;;  %v1600_v24 = vld [vmem:[%s1822_s23 + $0x68] sm:$0xff]   ;;  %p1614_p3 = por %p1613_p2, %p1612_p1 }
  0x20   : > { %456 = vmatprep.subr.bf16.mxu0 %v1583_v9  ;;  %1500 = vmatprep.subr.bf16.mxu1 %v1583_v9  ;;  %v1601_v25 = vld [vmem:[%s1822_s23 + $0x30] sm:$0xff]   ;;  %v1603_v27 = vld [vmem:[%s1822_s23 + $0x38] sm:$0xff]  }
  0x21   : > { %v1602_v26 = vld [vmem:[%s1822_s23 + $0x70] sm:$0xff]   ;;  %v1604_v28 = vld [vmem:[%s1822_s23 + $0x78] sm:$0xff]   ;;  %s1304_s23 = sshll.u32 %s1707_s15, 11  ;;  %p1615_p5 = pnand %p1614_p3, %p1608_p0 }
  0x22   : > { %s1930_s30 = scalar_lea.hbm %s2023_s2, %s1304_s23  ;;  %s1937_s5 = scalar_lea.hbm %s2024_s3, %s1304_s23 }
  0x23   : > { %457 = vmatpush1.bf16.msra.mxu0 %v1585_v10  ;;  %1506 = vmatpush1.bf16.msra.mxu1 %v1585_v10 }
  0x24   : > { %458 = vmatprep.subr.bf16.mxu0 %v1586_v11  ;;  %1501 = vmatprep.subr.bf16.mxu1 %v1586_v11 }
  0x27   : > { %459 = vmatpush1.bf16.msra.mxu0 %v1588_v12  ;;  %1507 = vmatpush1.bf16.msra.mxu1 %v1588_v12 }
  0x2a   : > { %1151 = vmatmul.mubr.msk.bf16.vlgmr.msra.gmra.mrb[0].mxu0 %vm399_vm0, %v1589_v13  ;;  %1159 = vmatmul.mubr.msk.bf16.vlgmr.msra.gmra.mrb[0].mxu1 %vm399_vm0, %v1590_v14 }
  0x2b   : > { %490 = vmatprep.mubr.bf16.mxu0 %v1717_v2  ;;  %570 = vmatprep.mubr.bf16.mxu1 %v1717_v2 }
  0x32   : > { %1152 = vmatmul.mubr.msk.bf16.gmra.mrb[4].mxu0 %vm399_vm0, %v1591_v15  ;;  %1160 = vmatmul.mubr.msk.bf16.gmra.mrb[4].mxu1 %vm399_vm0, %v1592_v16 }
  0x33   : > { %500 = vmatprep.mubr.bf16.mxu0 %v1717_v2  ;;  %580 = vmatprep.mubr.bf16.mxu1 %v1717_v2 }
  0x3a   : > { %1153 = vmatmul.mubr.msk.bf16.gmra.mrb[8].mxu0 %vm399_vm0, %v1593_v17  ;;  %1161 = vmatmul.mubr.msk.bf16.gmra.mrb[8].mxu1 %vm399_vm0, %v1594_v18 }
  0x3b   : > { %510 = vmatprep.mubr.bf16.mxu0 %v1717_v2  ;;  %590 = vmatprep.mubr.bf16.mxu1 %v1717_v2 }
  0x42   : > { %1154 = vmatmul.mubr.msk.bf16.gmra.mrb[12].mxu0 %vm399_vm0, %v1595_v19  ;;  %1162 = vmatmul.mubr.msk.bf16.gmra.mrb[12].mxu1 %vm399_vm0, %v1596_v20 }
  0x43   : > { %520 = vmatprep.mubr.bf16.mxu0 %v1717_v2  ;;  %600 = vmatprep.mubr.bf16.mxu1 %v1717_v2 }
  0x4a   : > { %1155 = vmatmul.mubr.msk.bf16.gmra.mrb[16].mxu0 %vm399_vm0, %v1597_v21  ;;  %1163 = vmatmul.mubr.msk.bf16.gmra.mrb[16].mxu1 %vm399_vm0, %v1598_v22 }
  0x4b   : > { %530 = vmatprep.mubr.bf16.mxu0 %v1717_v2  ;;  %610 = vmatprep.mubr.bf16.mxu1 %v1717_v2 }
  0x52   : > { %1156 = vmatmul.mubr.msk.bf16.gmra.mrb[20].mxu0 %vm399_vm0, %v1599_v23  ;;  %1164 = vmatmul.mubr.msk.bf16.gmra.mrb[20].mxu1 %vm399_vm0, %v1600_v24 }
  0x53   : > { %540 = vmatprep.mubr.bf16.mxu0 %v1717_v2  ;;  %620 = vmatprep.mubr.bf16.mxu1 %v1717_v2 }
  0x5a   : > { %1157 = vmatmul.mubr.msk.bf16.gmra.mrb[24].mxu0 %vm399_vm0, %v1601_v25  ;;  %1165 = vmatmul.mubr.msk.bf16.gmra.mrb[24].mxu1 %vm399_vm0, %v1602_v26 }
  0x5b   : > { %550 = vmatprep.mubr.bf16.mxu0 %v1717_v2  ;;  %630 = vmatprep.mubr.bf16.mxu1 %v1717_v2 }
  0x62   : > { %1158 = vmatmul.mubr.msk.bf16.gmra.mrb[28].mxu0 %vm399_vm0, %v1603_v27  ;;  %1166 = vmatmul.mubr.msk.bf16.gmra.mrb[28].mxu1 %vm399_vm0, %v1604_v28 }
  0xfd   : > { %v482_v29 = vpop.f32.mrb[0].mxu0  ;;  %v562_v30 = vpop.f32.mrb[0].mxu1 }
  0xfe   : > { %v484_v31 = vpop.f32.mrb[1].mxu0  ;;  %v564_v32 = vpop.f32.mrb[1].mxu1 }
  0xff   : > { %v486_v33 = vpop.f32.mrb[2].mxu0  ;;  %v566_v34 = vpop.f32.mrb[2].mxu1 }
 0x100   : > { %v1309_v35 = vpack.c.bf16 %v486_v33, %v482_v29  ;;  %v1349_v36 = vpack.c.bf16 %v566_v34, %v562_v30  ;;  %v488_v37 = vpop.f32.mrb[3].mxu0  ;;  %v568_v38 = vpop.f32.mrb[3].mxu1 }
 0x101   : > { %v1389_v39 = vpack.c.bf16 %v488_v37, %v484_v31  ;;  %v1429_v40 = vpack.c.bf16 %v568_v38, %v564_v32 }
 0x102   : > { %1310 = vst [vmem:[%s1892_s19] sm:$0xff] %v1309_v35   ;;  %1473 = vst [vmem:[%s1892_s19 + $0x40] sm:$0xff] %v1349_v36  }
 0x103   : > { %1390 = vst [vmem:[%s1896_s21] sm:$0xff] %v1389_v39   ;;  %1488 = vst [vmem:[%s1896_s21 + $0x40] sm:$0xff] %v1429_v40  }
 0x105   : > { %v492_v41 = vpop.f32.mrb[4].mxu0  ;;  %v572_v42 = vpop.f32.mrb[4].mxu1 }
 0x106   : > { %v494_v43 = vpop.f32.mrb[5].mxu0  ;;  %v574_v44 = vpop.f32.mrb[5].mxu1 }
 0x107   : > { %v496_v45 = vpop.f32.mrb[6].mxu0  ;;  %v576_v46 = vpop.f32.mrb[6].mxu1 }
 0x108   : > { %v1314_v47 = vpack.c.bf16 %v496_v45, %v492_v41  ;;  %v1354_v48 = vpack.c.bf16 %v576_v46, %v572_v42  ;;  %v498_v49 = vpop.f32.mrb[7].mxu0  ;;  %v578_v50 = vpop.f32.mrb[7].mxu1 }
 0x109   : > { %v1394_v51 = vpack.c.bf16 %v498_v49, %v494_v43  ;;  %v1434_v52 = vpack.c.bf16 %v578_v50, %v574_v44 }
 0x10a   : > { %1466 = vst [vmem:[%s1892_s19 + $0x8] sm:$0xff] %v1314_v47   ;;  %1474 = vst [vmem:[%s1892_s19 + $0x48] sm:$0xff] %v1354_v48  }
 0x10b   : > { %1481 = vst [vmem:[%s1896_s21 + $0x8] sm:$0xff] %v1394_v51   ;;  %1489 = vst [vmem:[%s1896_s21 + $0x48] sm:$0xff] %v1434_v52  }
 0x10d   : > { %v502_v53 = vpop.f32.mrb[8].mxu0  ;;  %v582_v54 = vpop.f32.mrb[8].mxu1 }
 0x10e   : > { %v504_v55 = vpop.f32.mrb[9].mxu0  ;;  %v584_v56 = vpop.f32.mrb[9].mxu1 }
 0x10f   : > { %v506_v57 = vpop.f32.mrb[10].mxu0  ;;  %v586_v58 = vpop.f32.mrb[10].mxu1 }
 0x110   : > { %v1319_v59 = vpack.c.bf16 %v506_v57, %v502_v53  ;;  %v1359_v60 = vpack.c.bf16 %v586_v58, %v582_v54  ;;  %v508_v61 = vpop.f32.mrb[11].mxu0  ;;  %v588_v62 = vpop.f32.mrb[11].mxu1 }
 0x111   : > { %v1399_v63 = vpack.c.bf16 %v508_v61, %v504_v55  ;;  %v1439_v0 = vpack.c.bf16 %v588_v62, %v584_v56 }
 0x112   : > { %1467 = vst [vmem:[%s1892_s19 + $0x10] sm:$0xff] %v1319_v59   ;;  %1475 = vst [vmem:[%s1892_s19 + $0x50] sm:$0xff] %v1359_v60  }
 0x113   : > { %1482 = vst [vmem:[%s1896_s21 + $0x10] sm:$0xff] %v1399_v63   ;;  %1490 = vst [vmem:[%s1896_s21 + $0x50] sm:$0xff] %v1439_v0  }
 0x115   : > { %v512_v1 = vpop.f32.mrb[12].mxu0  ;;  %v592_v2 = vpop.f32.mrb[12].mxu1 }
 0x116   : > { %v514_v3 = vpop.f32.mrb[13].mxu0  ;;  %v594_v4 = vpop.f32.mrb[13].mxu1 }
 0x117   : > { %v516_v5 = vpop.f32.mrb[14].mxu0  ;;  %v596_v6 = vpop.f32.mrb[14].mxu1 }
 0x118   : > { %v1324_v7 = vpack.c.bf16 %v516_v5, %v512_v1  ;;  %v1364_v8 = vpack.c.bf16 %v596_v6, %v592_v2  ;;  %v518_v9 = vpop.f32.mrb[15].mxu0  ;;  %v598_v10 = vpop.f32.mrb[15].mxu1 }
 0x119   : > { %v1404_v11 = vpack.c.bf16 %v518_v9, %v514_v3  ;;  %v1444_v12 = vpack.c.bf16 %v598_v10, %v594_v4 }
 0x11a   : > { %1468 = vst [vmem:[%s1892_s19 + $0x18] sm:$0xff] %v1324_v7   ;;  %1476 = vst [vmem:[%s1892_s19 + $0x58] sm:$0xff] %v1364_v8  }
 0x11b   : > { %1483 = vst [vmem:[%s1896_s21 + $0x18] sm:$0xff] %v1404_v11   ;;  %1491 = vst [vmem:[%s1896_s21 + $0x58] sm:$0xff] %v1444_v12  }
 0x11d   : > { %v522_v13 = vpop.f32.mrb[16].mxu0  ;;  %v602_v14 = vpop.f32.mrb[16].mxu1 }
 0x11e   : > { %v524_v15 = vpop.f32.mrb[17].mxu0  ;;  %v604_v16 = vpop.f32.mrb[17].mxu1 }
 0x11f   : > { %v526_v17 = vpop.f32.mrb[18].mxu0  ;;  %v606_v18 = vpop.f32.mrb[18].mxu1 }
 0x120   : > { %v1329_v19 = vpack.c.bf16 %v526_v17, %v522_v13  ;;  %v1369_v20 = vpack.c.bf16 %v606_v18, %v602_v14  ;;  %v528_v21 = vpop.f32.mrb[19].mxu0  ;;  %v608_v22 = vpop.f32.mrb[19].mxu1 }
 0x121   : > { %v1409_v23 = vpack.c.bf16 %v528_v21, %v524_v15  ;;  %v1449_v24 = vpack.c.bf16 %v608_v22, %v604_v16 }
 0x122   : > { %1469 = vst [vmem:[%s1892_s19 + $0x20] sm:$0xff] %v1329_v19   ;;  %1477 = vst [vmem:[%s1892_s19 + $0x60] sm:$0xff] %v1369_v20  }
 0x123   : > { %1484 = vst [vmem:[%s1896_s21 + $0x20] sm:$0xff] %v1409_v23   ;;  %1492 = vst [vmem:[%s1896_s21 + $0x60] sm:$0xff] %v1449_v24  }
 0x125   : > { %v532_v25 = vpop.f32.mrb[20].mxu0  ;;  %v612_v26 = vpop.f32.mrb[20].mxu1 }
 0x126   : > { %v534_v27 = vpop.f32.mrb[21].mxu0  ;;  %v614_v28 = vpop.f32.mrb[21].mxu1 }
 0x127   : > { %v536_v29 = vpop.f32.mrb[22].mxu0  ;;  %v616_v30 = vpop.f32.mrb[22].mxu1 }
 0x128   : > { %v1334_v31 = vpack.c.bf16 %v536_v29, %v532_v25  ;;  %v1374_v32 = vpack.c.bf16 %v616_v30, %v612_v26  ;;  %v538_v33 = vpop.f32.mrb[23].mxu0  ;;  %v618_v34 = vpop.f32.mrb[23].mxu1 }
 0x129   : > { %v1414_v35 = vpack.c.bf16 %v538_v33, %v534_v27  ;;  %v1454_v36 = vpack.c.bf16 %v618_v34, %v614_v28 }
 0x12a   : > { %1470 = vst [vmem:[%s1892_s19 + $0x28] sm:$0xff] %v1334_v31   ;;  %1478 = vst [vmem:[%s1892_s19 + $0x68] sm:$0xff] %v1374_v32  }
 0x12b   : > { %1485 = vst [vmem:[%s1896_s21 + $0x28] sm:$0xff] %v1414_v35   ;;  %1493 = vst [vmem:[%s1896_s21 + $0x68] sm:$0xff] %v1454_v36  }
 0x12d   : > { %v542_v37 = vpop.f32.mrb[24].mxu0  ;;  %v622_v38 = vpop.f32.mrb[24].mxu1 }
 0x12e   : > { %v544_v39 = vpop.f32.mrb[25].mxu0  ;;  %v624_v40 = vpop.f32.mrb[25].mxu1 }
 0x12f   : > { %v546_v41 = vpop.f32.mrb[26].mxu0  ;;  %v626_v42 = vpop.f32.mrb[26].mxu1 }
 0x130   : > { %v1339_v43 = vpack.c.bf16 %v546_v41, %v542_v37  ;;  %v1379_v44 = vpack.c.bf16 %v626_v42, %v622_v38  ;;  %v548_v45 = vpop.f32.mrb[27].mxu0  ;;  %v628_v46 = vpop.f32.mrb[27].mxu1 }
 0x131   : > { %v1419_v47 = vpack.c.bf16 %v548_v45, %v544_v39  ;;  %v1459_v48 = vpack.c.bf16 %v628_v46, %v624_v40 }
 0x132   : > { %1471 = vst [vmem:[%s1892_s19 + $0x30] sm:$0xff] %v1339_v43   ;;  %1479 = vst [vmem:[%s1892_s19 + $0x70] sm:$0xff] %v1379_v44  }
 0x133   : > { %1486 = vst [vmem:[%s1896_s21 + $0x30] sm:$0xff] %v1419_v47   ;;  %1494 = vst [vmem:[%s1896_s21 + $0x70] sm:$0xff] %v1459_v48  }
 0x135   : > { %v552_v49 = vpop.f32.mrb[28].mxu0  ;;  %v632_v50 = vpop.f32.mrb[28].mxu1 }
 0x136   : > { %v554_v51 = vpop.f32.mrb[29].mxu0  ;;  %v634_v52 = vpop.f32.mrb[29].mxu1 }
 0x137   : > { %v556_v53 = vpop.f32.mrb[30].mxu0  ;;  %v636_v54 = vpop.f32.mrb[30].mxu1 }
 0x138   : > { %v1344_v55 = vpack.c.bf16 %v556_v53, %v552_v49  ;;  %v1384_v56 = vpack.c.bf16 %v636_v54, %v632_v50  ;;  %v558_v57 = vpop.f32.mrb[31].mxu0  ;;  %v638_v58 = vpop.f32.mrb[31].mxu1 }
 0x139   : > { %v1424_v59 = vpack.c.bf16 %v558_v57, %v554_v51  ;;  %v1464_v60 = vpack.c.bf16 %v638_v58, %v634_v52 }
 0x13a   : > { %1472 = vst [vmem:[%s1892_s19 + $0x38] sm:$0xff] %v1344_v55   ;;  %1480 = vst [vmem:[%s1892_s19 + $0x78] sm:$0xff] %v1384_v56  }
 0x13b   : > { %1487 = vst [vmem:[%s1896_s21 + $0x38] sm:$0xff] %v1424_v59   ;;  %1495 = vst [vmem:[%s1896_s21 + $0x78] sm:$0xff] %v1464_v60  }
 0x13c   : > { %1618 = shalt.err (!%p1615_p5)
}
 0x13d   : > { %s1619_s18 = scalar_lea.hbm %s1930_s30, 2048  ;;  %s1623_s23 = scalar_lea.hbm %s2023_s2, 4096 }
 0x13e   : > { %p1620_p6 = scmp.ne.s32.totalorder %s1930_s30, %s1619_s18  ;;  %p1624_p10 = scmp.lt.u32.totalorder %s1930_s30, %s2023_s2 }
 0x13f   : > { %p1625_p11 = scmp.lt.u32.totalorder %s1623_s23, %s1619_s18  ;;  %p1627_p13 = scmp.lt.u32.totalorder %s1619_s18, %s1930_s30 }
 0x140   : > { %p1621_p7 = pnand %p1620_p6, %p1782_p4 }
 0x141   : > { %p1626_p12 = por %p1625_p11, %p1624_p10 }
 0x142   : > { %p1622_p9 = pneg %p1621_p7 }
 0x143   : > { %p1628_p0 = por %p1627_p13, %p1626_p12 }
 0x145   : > { %p1629_p1 = pnand %p1628_p0, %p1622_p9 }
 0x147   : > { %1632 = shalt.err (!%p1629_p1)
}
 0x148   : > { %s1719_s15 = smov 64   ;;  %s1720_s4 = smov 4  }
 0x149   : > { %1508 = dma.vmem_to_hbm [thread:$0]  (%p1782_p4), %s1932_s26, 2048, %s1930_s30, %s962_s6, %s1719_s15, %s1719_s15, %s1720_s4  }
 0x14a   : > { %s967_s7 = scalar_lea.sflag [#allocation5], %s1889_s11  ;;  %s1633_s8 = scalar_lea.vmem %s1939_s27, 2048 }
 0x14b   : > { %p1634_p2 = scmp.ne.s32.totalorder %s1939_s27, %s1633_s8  ;;  %s1721_s9 = smov [#allocation4]  }
 0x14c   : > { %s1637_s10 = sshll.u32 %s1721_s9, 4  ;;  %s1638_s10 = int_to_ptr.vmem [resolvable:$false] %s1637_s10 }
 0x14d   : > { %p1635_p3 = pnand %p1634_p2, %p1782_p4  ;;  %s1639_s18 = scalar_lea.vmem %s1638_s10, 4096 }
 0x14e   : > { %p1640_p6 = scmp.lt.s32.totalorder %s1939_s27, %s1638_s10  ;;  %p1641_p7 = scmp.lt.s32.totalorder %s1639_s18, %s1633_s8 }
 0x14f   : > { %p1636_p5 = pneg %p1635_p3 }
 0x150   : > { %p1642_p9 = por %p1641_p7, %p1640_p6 }
 0x152   : > { %p1643_p10 = pnand %p1642_p9, %p1636_p5 }
 0x154   : > { %1646 = shalt.err (!%p1643_p10)
}
 0x155   : > { %s1647_s26 = scalar_lea.hbm %s1937_s5, 2048  ;;  %s1651_s19 = scalar_lea.hbm %s2024_s3, 4096 }
 0x156   : > { %p1648_p11 = scmp.ne.s32.totalorder %s1937_s5, %s1647_s26  ;;  %p1652_p0 = scmp.lt.u32.totalorder %s1937_s5, %s2024_s3 }
 0x157   : > { %p1653_p1 = scmp.lt.u32.totalorder %s1651_s19, %s1647_s26  ;;  %p1655_p3 = scmp.lt.u32.totalorder %s1647_s26, %s1937_s5 }
 0x158   : > { %p1649_p12 = pnand %p1648_p11, %p1782_p4 }
 0x159   : > { %p1654_p2 = por %p1653_p1, %p1652_p0 }
 0x15a   : > { %p1650_p13 = pneg %p1649_p12 }
 0x15b   : > { %p1656_p5 = por %p1655_p3, %p1654_p2 }
 0x15d   : > { %p1657_p6 = pnand %p1656_p5, %p1650_p13 }
 0x15f   : > { %1660 = shalt.err (!%p1657_p6)
}
 0x160   : > { %1509 = dma.vmem_to_hbm [thread:$0]  (%p1782_p4), %s1939_s27, 2048, %s1937_s5, %s967_s7, %s1719_s15, %s1719_s15, %s1720_s4  }
 0x161 PF: > { %p1519_p7 = scmp.ge.s32.totalorder %s1715_s17, 2  ;;  %s1015_s28 = sand.u32 1, %s1695_s12  }
 0x162   : > { %s1016_s29 = scalar_lea.sflag [#allocation3], %s1015_s28 }
 0x163   : > { %p1513_p9 = pnand %p1519_p7, %p1789_p8 }
 0x165   : > { %1686 = dma.done.wait (!%p1513_p9), %s1016_s29, 2048  }
 0x166   : > { %1688 = vsyncadd (!%p1513_p9), %s1016_s29, 4294965248  ;;  %s1025_s22 = scalar_lea.sflag [#allocation5], %s1015_s28 }
 0x167   : > { %1690 = dma.done.wait (!%p1513_p9), %s1025_s22, 2048  }
 0x168   : > { %1692 = vsyncadd (!%p1513_p9), %s1025_s22, 4294965248  ;;  %s20_s17 = sadd.s32 1, %s1715_s17   ;;  %s2027_s12 = smov %s1699_s13 }
 0x169   : > { %p17_p10 = scmp.ge.s32.totalorder %s20_s17, 4   ;;  %s2028_s13 = smov %s1703_s14 }
 0x16a   : > { %s2029_s14 = smov %s1795_s25  ;;  %s2030_s15 = smov %s1711_s16 }
 0x16b   : > { %s2031_s16 = smov %s2033_s20  ;;  %19 = sbr.rel (!%p17_p10) target bundleno = 6 (0x6), region = 80 }
 0x172   :  { %1030 = vsyncpa [#allocation3], 1 }
 0x173   :  { %1032 = vsyncpa [#allocation3 + $0x1], 1 }
 0x174   :  { %1033 = vsyncpa [#allocation5], 1 }
 0x175   :  { %1035 = vsyncpa [#allocation5 + $0x1], 1 }

</bundles_post_ra>
